<compile_context>
chip_gen: v6e
topology: v6e:2x2x1
jax: 0.10.0
libtpu: 0.0.40
codegen_flags: <defaults>
</compile_context>

<pallas_src>
import jax
import jax.numpy as jnp
from jax.experimental import pallas as pl
from jax.experimental.pallas import tpu as pltpu

LANES = 128
SUBLANES = 8


def smooth_l1_loss(outputs: jax.Array, target: jax.Array,
                   *, rows_per_tile: int = 2048) -> jax.Array:
    """Masked smooth-L1 loss (scalar), matching the PyTorch SmoothL1Loss module."""
    assert outputs.shape == target.shape
    n = outputs.size

    o_flat = outputs.reshape(-1)
    t_flat = target.reshape(-1)

    # Only pad when the flat size is not already a multiple of 8*128.  Padded
    # target elements are 0, so they contribute 0 to both sums.
    pad_to = SUBLANES * LANES
    n_pad = (-n) % pad_to
    if n_pad:
        o_flat = jnp.pad(o_flat, (0, n_pad))
        t_flat = jnp.pad(t_flat, (0, n_pad))
    rows = (n + n_pad) // LANES          # multiple of 8
    o2 = o_flat.reshape(rows, LANES)
    t2 = t_flat.reshape(rows, LANES)

    tile_rows = min(rows_per_tile, rows)  # both multiples of 8 -> no shrink loop
    n_tiles = pl.cdiv(rows, tile_rows)

    # Split the tile range across (up to) two TensorCores; ~2x streaming on v7x,
    # harmless (one extra grid step at most) on single-TC chips.
    n_cores = 2 if n_tiles >= 2 else 1
    tiles_per_core = pl.cdiv(n_tiles, n_cores)

    # In-kernel row masking is only needed if the last tile is partial or a core
    # gets a clamped (duplicate) tile; otherwise skip the extra VPU work.
    needs_masking = (rows % tile_rows != 0) or (n_cores * tiles_per_core != n_tiles)

    def index_map(c, j):
        # Clamp so the DMA never starts past the array; duplicate (clamped)
        # tiles contribute 0 because the kernel masks with the UNclamped index.
        return (jnp.minimum(c * tiles_per_core + j, n_tiles - 1), 0)

    def kernel(o_ref, t_ref, out_ref, loss_acc, mask_acc):
        c = pl.program_id(0)
        j = pl.program_id(1)

        @pl.when(j == 0)
        def _():
            loss_acc[c] = jnp.zeros((SUBLANES, LANES), jnp.float32)
            mask_acc[c] = jnp.zeros((SUBLANES, LANES), jnp.float32)

        o = o_ref[...].astype(jnp.float32)
        t = t_ref[...].astype(jnp.float32)

        valid = t != 0.0                                  # torch.ne(target, 0)
        if needs_masking:
            tile_idx = c * tiles_per_core + j             # unclamped on purpose
            row_ids = tile_idx * tile_rows + jax.lax.broadcasted_iota(
                jnp.int32, (tile_rows, LANES), 0)
            valid = jnp.logical_and(valid, row_ids < rows)

        d = jnp.abs(o - t)
        elem = jnp.where(d < 1.0, 0.5 * d * d, d - 0.5)   # smooth_l1, beta=1
        loss = jnp.where(valid, elem, 0.0)                # smooth_l1(0,0)==0
        mask = valid.astype(jnp.float32)

        # Fold (tile_rows, 128) -> (8, 128) with plain VPU adds; accumulate in VMEM.
        loss_acc[c] += jnp.sum(loss.reshape(-1, SUBLANES, LANES), axis=0)
        mask_acc[c] += jnp.sum(mask.reshape(-1, SUBLANES, LANES), axis=0)

        # Single cross-lane reduction + SMEM write, once per core.
        @pl.when(j == pl.num_programs(1) - 1)
        def _():
            out_ref[0, 0] = jnp.sum(loss_acc[c])
            out_ref[0, 1] = jnp.sum(mask_acc[c])

    partials = pl.pallas_call(
        kernel,
        out_shape=jax.ShapeDtypeStruct((n_cores, 2), jnp.float32),
        grid_spec=pltpu.PrefetchScalarGridSpec(
            num_scalar_prefetch=0,
            grid=(n_cores, tiles_per_core),
            in_specs=[
                pl.BlockSpec((tile_rows, LANES), index_map),
                pl.BlockSpec((tile_rows, LANES), index_map),
            ],
            out_specs=pl.BlockSpec(
                (1, 2), lambda c, j: (c, 0), memory_space=pltpu.SMEM),
            scratch_shapes=[
                pltpu.VMEM((n_cores, SUBLANES, LANES), jnp.float32),  # loss acc
                pltpu.VMEM((n_cores, SUBLANES, LANES), jnp.float32),  # mask acc
            ],
        ),
        compiler_params=pltpu.CompilerParams(
            dimension_semantics=("parallel", "arbitrary")),
    )(o2, t2)

    loss_sum = jnp.sum(partials[:, 0])
    mask_sum = jnp.sum(partials[:, 1])
    return loss_sum / (1.0 + mask_sum)


def _reference(outputs, target):
    mask = (target != 0).astype(jnp.float32)
    d = jnp.abs(outputs * mask - target * mask)
    loss = jnp.where(d < 1.0, 0.5 * d * d, d - 0.5)
    return jnp.sum(loss) / (1.0 + jnp.sum(mask))


if __name__ == "__main__":
    key = jax.random.PRNGKey(0)
    k1, k2, k3 = jax.random.split(key, 3)

    # NCHW inputs, like the PyTorch module would see (e.g. depth-completion maps).
    shape = (2, 4, 16, 16)
    outputs = jax.random.normal(k1, shape, dtype=jnp.float32)
    target = jax.random.normal(k2, shape, dtype=jnp.float32)
    # Make ~40% of target pixels exactly zero so the validity mask is exercised.
    zero_mask = jax.random.uniform(k3, shape) < 0.4
    target = jnp.where(zero_mask, 0.0, target)

    result = jax.block_until_ready(smooth_l1_loss(outputs, target))
    ref = jax.block_until_ready(_reference(outputs, target))
    assert jnp.allclose(result, ref, rtol=1e-5, atol=1e-6), (result, ref)

    # Second small check: unaligned size + multi-tile + 2-way core split +
    # clamped duplicate tile (exercises the in-kernel masking path).
    shape2 = (2, 3, 20, 20)   # 2400 elems -> padded to 3072 (24 rows)
    o2 = jax.random.normal(k1, shape2, dtype=jnp.float32)
    t2 = jax.random.normal(k2, shape2, dtype=jnp.float32)
    t2 = jnp.where(jax.random.uniform(k3, shape2) < 0.4, 0.0, t2)
    res2 = jax.block_until_ready(smooth_l1_loss(o2, t2, rows_per_tile=8))
    ref2 = jax.block_until_ready(_reference(o2, t2))
    assert jnp.allclose(res2, ref2, rtol=1e-5, atol=1e-6), (res2, ref2)

    print("KERNEL_OK")
</pallas_src>

<mosaic_0001>
module attributes {stable_mosaic.version = 11 : i64} {
  func.func @kernel(%arg0: i32, %arg1: i32, %arg2: memref<16x128xf32, #tpu.memory_space<vmem>>, %arg3: memref<16x128xf32, #tpu.memory_space<vmem>>, %arg4: memref<1x2xf32, #tpu.memory_space<smem>>, %arg5: memref<1x8x128xf32, #tpu.memory_space<vmem>>, %arg6: memref<1x8x128xf32, #tpu.memory_space<vmem>>) attributes {dimension_semantics = [#tpu.dimension_semantics<parallel>, #tpu.dimension_semantics<arbitrary>], iteration_bounds = array<i64: 1, 1>, scalar_prefetch = 0 : i64, scratch_operands = 2 : i64, tpu.core_type = #tpu.core_type<tc>, window_params = [{transform_indices = @transform_0, window_bounds = array<i64: 16, 128>}, {transform_indices = @transform_1, window_bounds = array<i64: 16, 128>}, {transform_indices = @transform_2, window_bounds = array<i64: 1, 2>}]} {
    %c0_i32 = arith.constant 0 : i32
    %0 = arith.cmpi eq, %arg1, %c0_i32 : i32
    %1 = arith.extui %0 : i1 to i32
    %c0_i32_0 = arith.constant 0 : i32
    %2 = arith.cmpi ne, %1, %c0_i32_0 : i32
    scf.if %2 {
      %cst_20 = arith.constant 0.000000e+00 : f32
      %44 = vector.broadcast %cst_20 : f32 to vector<8x128xf32>
      %45 = arith.index_cast %arg0 : i32 to index
      %c0_21 = arith.constant 0 : index
      %c0_22 = arith.constant 0 : index
      %46 = vector.load %arg5[%45, %c0_21, %c0_22] : memref<1x8x128xf32, #tpu.memory_space<vmem>>, vector<1x8x128xf32>
      %47 = vector.shape_cast %46 : vector<1x8x128xf32> to vector<8x128xf32>
      %48 = vector.shape_cast %44 : vector<8x128xf32> to vector<1x8x128xf32>
      tpu.vector_store %arg5[%45, %c0_21, %c0_22], %48 {strides = array<i32>} : memref<1x8x128xf32, #tpu.memory_space<vmem>>, vector<1x8x128xf32>,
      %cst_23 = arith.constant 0.000000e+00 : f32
      %49 = vector.broadcast %cst_23 : f32 to vector<8x128xf32>
      %50 = arith.index_cast %arg0 : i32 to index
      %c0_24 = arith.constant 0 : index
      %c0_25 = arith.constant 0 : index
      %51 = vector.load %arg6[%50, %c0_24, %c0_25] : memref<1x8x128xf32, #tpu.memory_space<vmem>>, vector<1x8x128xf32>
      %52 = vector.shape_cast %51 : vector<1x8x128xf32> to vector<8x128xf32>
      %53 = vector.shape_cast %49 : vector<8x128xf32> to vector<1x8x128xf32>
      tpu.vector_store %arg6[%50, %c0_24, %c0_25], %53 {strides = array<i32>} : memref<1x8x128xf32, #tpu.memory_space<vmem>>, vector<1x8x128xf32>,
    } else {
    }
    %c0 = arith.constant 0 : index
    %c0_1 = arith.constant 0 : index
    %3 = vector.load %arg2[%c0, %c0_1] : memref<16x128xf32, #tpu.memory_space<vmem>>, vector<16x128xf32>
    %c0_2 = arith.constant 0 : index
    %c0_3 = arith.constant 0 : index
    %4 = vector.load %arg3[%c0_2, %c0_3] : memref<16x128xf32, #tpu.memory_space<vmem>>, vector<16x128xf32>
    %cst = arith.constant 0.000000e+00 : f32
    %5 = vector.broadcast %cst : f32 to vector<16x128xf32>
    %6 = arith.cmpf one, %4, %5 : vector<16x128xf32>
    %7 = arith.subf %3, %4 : vector<16x128xf32>
    %8 = math.absf %7 : vector<16x128xf32>
    %cst_4 = arith.constant 1.000000e+00 : f32
    %9 = vector.broadcast %cst_4 : f32 to vector<16x128xf32>
    %10 = arith.cmpf olt, %8, %9 : vector<16x128xf32>
    %cst_5 = arith.constant 5.000000e-01 : f32
    %11 = vector.broadcast %cst_5 : f32 to vector<16x128xf32>
    %12 = arith.mulf %11, %8 : vector<16x128xf32>
    %13 = arith.mulf %12, %8 : vector<16x128xf32>
    %cst_6 = arith.constant 5.000000e-01 : f32
    %14 = vector.broadcast %cst_6 : f32 to vector<16x128xf32>
    %15 = arith.subf %8, %14 : vector<16x128xf32>
    %16 = arith.select %10, %13, %15 : vector<16x128xi1>, vector<16x128xf32>
    %cst_7 = arith.constant 0.000000e+00 : f32
    %17 = vector.broadcast %cst_7 : f32 to vector<16x128xf32>
    %18 = arith.select %6, %16, %17 : vector<16x128xi1>, vector<16x128xf32>
    %19 = arith.extui %6 : vector<16x128xi1> to vector<16x128xi32>
    %20 = arith.sitofp %19 : vector<16x128xi32> to vector<16x128xf32>
    %21 = arith.index_cast %arg0 : i32 to index
    %c0_8 = arith.constant 0 : index
    %c0_9 = arith.constant 0 : index
    %22 = vector.load %arg5[%21, %c0_8, %c0_9] : memref<1x8x128xf32, #tpu.memory_space<vmem>>, vector<1x8x128xf32>
    %23 = vector.shape_cast %22 : vector<1x8x128xf32> to vector<8x128xf32>
    %24 = vector.shape_cast %18 : vector<16x128xf32> to vector<2x8x128xf32>
    %cst_10 = arith.constant dense<0.000000e+00> : vector<8x128xf32>
    %25 = vector.multi_reduction <add>, %24, %cst_10 [0] : vector<2x8x128xf32> to vector<8x128xf32>
    %26 = arith.addf %23, %25 : vector<8x128xf32>
    %27 = arith.index_cast %arg0 : i32 to index
    %c0_11 = arith.constant 0 : index
    %c0_12 = arith.constant 0 : index
    %28 = vector.load %arg5[%27, %c0_11, %c0_12] : memref<1x8x128xf32, #tpu.memory_space<vmem>>, vector<1x8x128xf32>
    %29 = vector.shape_cast %28 : vector<1x8x128xf32> to vector<8x128xf32>
    %30 = vector.shape_cast %26 : vector<8x128xf32> to vector<1x8x128xf32>
    tpu.vector_store %arg5[%27, %c0_11, %c0_12], %30 {strides = array<i32>} : memref<1x8x128xf32, #tpu.memory_space<vmem>>, vector<1x8x128xf32>,
    %31 = arith.index_cast %arg0 : i32 to index
    %c0_13 = arith.constant 0 : index
    %c0_14 = arith.constant 0 : index
    %32 = vector.load %arg6[%31, %c0_13, %c0_14] : memref<1x8x128xf32, #tpu.memory_space<vmem>>, vector<1x8x128xf32>
    %33 = vector.shape_cast %32 : vector<1x8x128xf32> to vector<8x128xf32>
    %34 = vector.shape_cast %20 : vector<16x128xf32> to vector<2x8x128xf32>
    %cst_15 = arith.constant dense<0.000000e+00> : vector<8x128xf32>
    %35 = vector.multi_reduction <add>, %34, %cst_15 [0] : vector<2x8x128xf32> to vector<8x128xf32>
    %36 = arith.addf %33, %35 : vector<8x128xf32>
    %37 = arith.index_cast %arg0 : i32 to index
    %c0_16 = arith.constant 0 : index
    %c0_17 = arith.constant 0 : index
    %38 = vector.load %arg6[%37, %c0_16, %c0_17] : memref<1x8x128xf32, #tpu.memory_space<vmem>>, vector<1x8x128xf32>
    %39 = vector.shape_cast %38 : vector<1x8x128xf32> to vector<8x128xf32>
    %40 = vector.shape_cast %36 : vector<8x128xf32> to vector<1x8x128xf32>
    tpu.vector_store %arg6[%37, %c0_16, %c0_17], %40 {strides = array<i32>} : memref<1x8x128xf32, #tpu.memory_space<vmem>>, vector<1x8x128xf32>,
    %c0_i32_18 = arith.constant 0 : i32
    %41 = arith.cmpi eq, %arg1, %c0_i32_18 : i32
    %42 = arith.extui %41 : i1 to i32
    %c0_i32_19 = arith.constant 0 : i32
    %43 = arith.cmpi ne, %42, %c0_i32_19 : i32
    scf.if %43 {
      %44 = arith.index_cast %arg0 : i32 to index
      %c0_20 = arith.constant 0 : index
      %c0_21 = arith.constant 0 : index
      %45 = vector.load %arg5[%44, %c0_20, %c0_21] : memref<1x8x128xf32, #tpu.memory_space<vmem>>, vector<1x8x128xf32>
      %46 = vector.shape_cast %45 : vector<1x8x128xf32> to vector<8x128xf32>
      %47 = vector.shape_cast %46 : vector<8x128xf32> to vector<1x8x128xf32>
      %cst_22 = arith.constant dense<0.000000e+00> : vector<1xf32>
      %48 = vector.multi_reduction <add>, %47, %cst_22 [1, 2] : vector<1x8x128xf32> to vector<1xf32>
      %49 = vector.shape_cast %48 : vector<1xf32> to vector<1x1x1xf32>
      %50 = vector.extract %49[0, 0, 0] : f32 from vector<1x1x1xf32>
      %c0_23 = arith.constant 0 : index
      %c0_24 = arith.constant 0 : index
      %51 = memref.load %arg4[%c0_23, %c0_24] : memref<1x2xf32, #tpu.memory_space<smem>>
      memref.store %50, %arg4[%c0_23, %c0_24] : memref<1x2xf32, #tpu.memory_space<smem>>
      %52 = arith.index_cast %arg0 : i32 to index
      %c0_25 = arith.constant 0 : index
      %c0_26 = arith.constant 0 : index
      %53 = vector.load %arg6[%52, %c0_25, %c0_26] : memref<1x8x128xf32, #tpu.memory_space<vmem>>, vector<1x8x128xf32>
      %54 = vector.shape_cast %53 : vector<1x8x128xf32> to vector<8x128xf32>
      %55 = vector.shape_cast %54 : vector<8x128xf32> to vector<1x8x128xf32>
      %cst_27 = arith.constant dense<0.000000e+00> : vector<1xf32>
      %56 = vector.multi_reduction <add>, %55, %cst_27 [1, 2] : vector<1x8x128xf32> to vector<1xf32>
      %57 = vector.shape_cast %56 : vector<1xf32> to vector<1x1x1xf32>
      %58 = vector.extract %57[0, 0, 0] : f32 from vector<1x1x1xf32>
      %c0_28 = arith.constant 0 : index
      %c1 = arith.constant 1 : index
      %59 = memref.load %arg4[%c0_28, %c1] : memref<1x2xf32, #tpu.memory_space<smem>>
      memref.store %58, %arg4[%c0_28, %c1] : memref<1x2xf32, #tpu.memory_space<smem>>
    } else {
    }
    return
  }
  func.func @transform_0(%arg0: i32, %arg1: i32) -> (i32, i32) {
    %c1_i32 = arith.constant 1 : i32
    %0 = arith.muli %arg0, %c1_i32 : i32
    %1 = arith.addi %0, %arg1 : i32
    %c0_i32 = arith.constant 0 : i32
    %2 = arith.minsi %1, %c0_i32 : i32
    %c0_i32_0 = arith.constant 0 : i32
    %c0_i32_1 = arith.constant 0 : i32
    return %2, %c0_i32_0 : i32, i32
  }
  func.func @transform_1(%arg0: i32, %arg1: i32) -> (i32, i32) {
    %c1_i32 = arith.constant 1 : i32
    %0 = arith.muli %arg0, %c1_i32 : i32
    %1 = arith.addi %0, %arg1 : i32
    %c0_i32 = arith.constant 0 : i32
    %2 = arith.minsi %1, %c0_i32 : i32
    %c0_i32_0 = arith.constant 0 : i32
    %c0_i32_1 = arith.constant 0 : i32
    return %2, %c0_i32_0 : i32, i32
  }
  func.func @transform_2(%arg0: i32, %arg1: i32) -> (i32, i32) {
    %c0_i32 = arith.constant 0 : i32
    %c0_i32_0 = arith.constant 0 : i32
    return %arg0, %c0_i32 : i32, i32
  }
}

</mosaic_0001>

<bundles_post_ra>
// kernel: tpu_custom_call.1
= control target key start
LH: loop header
LB: loop body
LE: loop exit
PB: predicated region body
PF: predicated region fallthrough
CT: control target
= control target key end

     0   :  { %7 = vsyncpa [#allocation5], 0  ;;  %s250_s0 = inlined_call_operand.hbm [shape: f32[16,128], index: 0, kind: input, shape index: {}]   ;;  %s251_s1 = inlined_call_operand.hbm [shape: f32[16,128], index: 1, kind: input, shape index: {}]   ;;  %s252_s2 = inlined_call_operand.hbm [shape: f32[1,2], index: 2, kind: output, shape index: {}]  }
   0x1   :  { %8 = vsyncpa [#allocation8], 0 }
   0x2   :  { %9 = vsyncpa [#allocation6], 0  ;;  %s220_s9 = smov [#allocation4]  }
   0x3   :  { %s21_s10 = sshll.u32 %s220_s9, 4  ;;  %s22_s10 = int_to_ptr.vmem [resolvable:$true] %s21_s10 }
   0x4   :  { %s174_s11 = scalar_lea.vmem %s22_s10, 256  ;;  %p179_p1 = scmp.lt.s32.totalorder %s22_s10, %s22_s10 }
   0x5   :  { %p175_p0 = scmp.ne.s32.totalorder %s22_s10, %s174_s11  ;;  %p180_p2 = scmp.lt.s32.totalorder %s174_s11, %s174_s11 }
   0x7   :  { %p181_p3 = por %p180_p2, %p179_p1 }
   0x9   :  { %p182_p4 = pnand %p181_p3, %p175_p0 }
   0xb   :  { %185 = shalt.err (!%p182_p4)
}
   0xc   :  { %s221_s12 = smov 128   ;;  %s222_s13 = smov 8  }
   0xd   :  { %27 = dma.hbm_to_vmem [thread:$0]  %s250_s0, 256, %s22_s10, [#allocation5], %s221_s12, %s221_s12, %s222_s13  }
   0xe   :  { %s223_s16 = smov [#allocation7]  }
   0xf   :  { %s39_s17 = sshll.u32 %s223_s16, 4  ;;  %s40_s17 = int_to_ptr.vmem [resolvable:$true] %s39_s17 }
  0x10   :  { %s194_s18 = scalar_lea.vmem %s40_s17, 256  ;;  %p199_p6 = scmp.lt.s32.totalorder %s40_s17, %s40_s17 }
  0x11   :  { %p195_p5 = scmp.ne.s32.totalorder %s40_s17, %s194_s18  ;;  %p200_p7 = scmp.lt.s32.totalorder %s194_s18, %s194_s18 }
  0x13   :  { %p201_p8 = por %p200_p7, %p199_p6 }
  0x15   :  { %p202_p9 = pnand %p201_p8, %p195_p5 }
  0x17   :  { %205 = shalt.err (!%p202_p9)
}
  0x18   :  { %45 = dma.hbm_to_vmem [thread:$0]  %s251_s1, 256, %s40_s17, [#allocation8], %s221_s12, %s221_s12, %s222_s13  }
  0x19   :  { %214 = dma.done.wait [#allocation5], 256  }
  0x1a   :  { %215 = vsyncadd [#allocation5], 4294967040 }
  0x1b   :  { %216 = dma.done.wait [#allocation8], 256  }
  0x1c   :  { %217 = vsyncadd [#allocation8], 4294967040  ;;  %v69_v0 = vld [vmem:[#allocation4] sm:$0xff]  ;;  %v70_v1 = vld [vmem:[#allocation4 + $0x8] sm:$0xff]  ;;  %v224_v18 = vmov 0.0   ;;  %s225_s21 = smov [#allocation9]  }
  0x1d   :  { %v71_v2 = vld [vmem:[#allocation7] sm:$0xff]  ;;  %v72_v3 = vld [vmem:[#allocation7 + $0x8] sm:$0xff] }
  0x1e   :  { %v75_v4 = vsub.f32 %v69_v0, %v71_v2  ;;  %v76_v5 = vsub.f32 %v70_v1, %v72_v3  ;;  %vm73_vm1 = vcmp.ne.f32.partialorder %v71_v2, 0.0  ;;  %vm74_vm3 = vcmp.ne.f32.partialorder %v72_v3, 0.0 }
  0x1f   :  { %v154_v19 = vsel %vm73_vm1, 1.0, %v224_v18  ;;  %v155_v20 = vsel %vm74_vm3, 1.0, %v224_v18 }
  0x20   :  { %v77_v6 = vand.u32 2147483647, %v75_v4  ;;  %v78_v7 = vand.u32 2147483647, %v76_v5  ;;  %v103_v22 = vadd.f32 %v155_v20, %v154_v19 }
  0x22   :  { %v81_v8 = vmul.f32 0.5, %v77_v6  ;;  %v152_v9 = vadd.f32 -0.5, %v77_v6  ;;  %vm79_vm0 = vcmp.lt.f32.partialorder %v77_v6, 1.0  ;;  %v82_v10 = vmul.f32 0.5, %v78_v7 }
  0x23   :  { %v153_v11 = vadd.f32 -0.5, %v78_v7  ;;  %vm80_vm2 = vcmp.lt.f32.partialorder %v78_v7, 1.0 }
  0x24   :  { %v83_v12 = vmul.f32 %v81_v8, %v77_v6  ;;  %v84_v13 = vmul.f32 %v82_v10, %v78_v7 }
  0x26   :  { %v87_v14 = vsel %vm79_vm0, %v83_v12, %v152_v9  ;;  %v88_v15 = vsel %vm80_vm2, %v84_v13, %v153_v11 }
  0x27   :  { %v89_v16 = vsel %vm73_vm1, %v87_v14, 0.0  ;;  %v90_v17 = vsel %vm74_vm3, %v88_v15, 0.0 }
  0x28   :  { %v98_v21 = vadd.f32 %v90_v17, %v89_v16 }
  0x2a   :  { %110 = vadd.xlane.f32.xlu0 %v98_v21 }
  0x2e   :  { %122 = vadd.xlane.f32.xlu0 %v103_v22 }
  0xb3   :  { %v111_v23 = vpop.xlane.xlu0 %110 }
  0xb4   :  { %v112_v24 = vrot.slane %v111_v23, 4 }
  0xb6   :  { %v113_v25 = vadd.f32 %v112_v24, %v111_v23 }
  0xb7   :  { %v123_v26 = vpop.xlane.xlu0 %122 }
  0xb8   :  { %v114_v27 = vrot.slane %v113_v25, 2  ;;  %v124_v28 = vrot.slane %v123_v26, 4 }
  0xba   :  { %v125_v29 = vadd.f32 %v124_v28, %v123_v26  ;;  %v115_v30 = vadd.f32 %v114_v27, %v113_v25 }
  0xbc   :  { %v126_v31 = vrot.slane %v125_v29, 2  ;;  %v116_v32 = vrot.slane %v115_v30, 1 }
  0xbe   :  { %v127_v33 = vadd.f32 %v126_v31, %v125_v29  ;;  %v117_v34 = vadd.f32 %v116_v32, %v115_v30 }
  0xc0   :  { %156 = vpush %v117_v34  ;;  %v128_v35 = vrot.slane %v127_v33, 1 }
  0xc2   :  { %v129_v36 = vadd.f32 %v128_v35, %v127_v33 }
  0xc4   :  { %158 = vpush %v129_v36 }
  0xf1   :  { %s157_s0 = spop %156 }
  0xf2   :  { %120 = sst [smem:[#allocation9]] %s157_s0 }
  0xf5   :  { %s159_s1 = spop %158 }
  0xf6   :  { %132 = sst [smem:[#allocation9 + $0x1]] %s159_s1 }
  0xf7   :  { %140 = dma.smem_to_hbm %s225_s21, 16, %s252_s2, [#allocation6]  }
  0xf8   :  { %218 = dma.done.wait [#allocation6], 16  }
  0xf9   :  { %219 = vsyncadd [#allocation6], 4294967280 }
  0xfa   :  { %144 = sfence }
  0xfb   :  { %145 = vsyncpa [#allocation5], 1 }
  0xfc   :  { %146 = vsyncpa [#allocation8], 1 }
  0xfd   :  { %147 = vsyncpa [#allocation6], 1 }

</bundles_post_ra>
